<compile_context>
chip_gen: v5e
topology: v5e:2x2
jax: 0.10.0
libtpu: 0.0.40
codegen_flags: <defaults>
</compile_context>

<pallas_src>
import functools

import jax
import jax.numpy as jnp
from jax.experimental import pallas as pl
from jax.experimental.pallas import tpu as pltpu


def upconv_prelu_kernel(x_ref, w_ref, b_ref, a_ref, o_ref, *, compute_dtype):
    # x_ref: (Ci, tm) f32          w_ref: (8*Co, Ci) compute_dtype
    # b_ref: (8*Co, 1) f32         a_ref: (8*Co, 1) f32
    # o_ref: (8*Co, tm) scatter_dtype (bf16 by default)
    x = x_ref[...].astype(compute_dtype)                 # cast fused in-kernel
    y = jnp.dot(w_ref[...], x, preferred_element_type=jnp.float32)   # MXU, f32 acc
    y = y + b_ref[...]                                   # bias broadcast across lanes
    y = jnp.where(y > 0.0, y, a_ref[...] * y)            # per-(tap, co) PReLU slope
    o_ref[...] = y.astype(o_ref.dtype)


def _vmem_limit_bytes():
    """Per-chip scoped-VMEM limit: ~96 MiB on 128 MiB parts, <=48 MiB on v7x."""
    try:
        cap = int(pltpu.get_tpu_info().vmem_capacity_bytes)
    except Exception:
        cap = 64 * 1024 * 1024            # conservative: v7x physical VMEM
    limit = min((cap * 3) // 4, 96 * 1024 * 1024)
    return max(limit, 32 * 1024 * 1024)


def _pick_tile(s, kc, ci, *, out_itemsize, vmem_budget, min_blocks=1, target=2048):
    """Spatial tile: as big as the VMEM budget allows (multiple of 128), the full
    extent if small, split into >= min_blocks blocks (keeps both v7x TCs busy)."""
    per_lane = 2 * (ci * 4 + kc * out_itemsize)          # dbl-buffered x + out, per lane
    fixed = 2 * (kc * ci * 2 + 2 * kc * 4)               # weight + bias + alpha
    cap = min(target, s, max(128, (vmem_budget - fixed) // max(per_lane, 1)))
    if min_blocks > 1 and s > 128:
        cap = min(cap, max(128, pl.cdiv(s, min_blocks)))
    if s <= cap:
        return s
    cap = max(128, (cap // 128) * 128)
    for t in range(cap, 0, -128):                        # prefer an exact divisor of s
        if s % t == 0:
            return t
    return cap                                           # partial (masked) last block


def upconv_block(x, weight, bias, alpha, *,
                 compute_dtype=jnp.bfloat16,     # MXU operand dtype (float32 for exact)
                 scatter_dtype=jnp.bfloat16,     # dtype of the pre-scatter intermediate
                 out_dtype=jnp.float32,          # final output dtype (PyTorch parity)
                 tm_target=2048):
    """x: (N, Ci, D, H, W) f32
       weight: (Ci, Co, 2, 2, 2)  (PyTorch ConvTranspose3d layout)
       bias, alpha: (Co,)         (PReLU per-channel slope)
       returns (N, Co, 2D, 2H, 2W) out_dtype"""
    N, Ci, D, H, W = x.shape
    Ci_w, Co, kD, kH, kW = weight.shape
    assert (Ci_w, kD, kH, kW) == (Ci, 2, 2, 2)
    S = D * H * W
    KC = 8 * Co

    # ---- layout glue: input side is a free reshape only (cast happens in-kernel) ----
    x3 = x.reshape(N, Ci, S)                                              # (N, Ci, S) f32
    # rows ordered (kd, kh, kw, co); columns = ci
    wfT = jnp.transpose(weight, (2, 3, 4, 1, 0)).reshape(KC, Ci).astype(compute_dtype)
    b_col = jnp.tile(bias, 8).reshape(KC, 1).astype(jnp.float32)
    a_col = jnp.tile(alpha, 8).reshape(KC, 1).astype(jnp.float32)

    vmem_limit = _vmem_limit_bytes()
    out_itemsize = jnp.dtype(scatter_dtype).itemsize
    tm = _pick_tile(S, KC, Ci,
                    out_itemsize=out_itemsize,
                    vmem_budget=int(vmem_limit * 0.6),
                    min_blocks=2 if N == 1 else 1,
                    target=tm_target)
    n_tiles = pl.cdiv(S, tm)

    cost = pl.CostEstimate(
        flops=2 * N * S * Ci * KC,
        transcendentals=0,
        bytes_accessed=(N * Ci * S * 4                       # x (f32, read in-kernel)
                        + KC * Ci * jnp.dtype(compute_dtype).itemsize
                        + 2 * KC * 4                         # bias + alpha
                        + N * KC * S * out_itemsize),        # intermediate output
    )

    kernel = functools.partial(upconv_prelu_kernel, compute_dtype=compute_dtype)

    y3 = pl.pallas_call(
        kernel,
        out_shape=jax.ShapeDtypeStruct((N, KC, S), scatter_dtype),
        grid_spec=pltpu.PrefetchScalarGridSpec(
            num_scalar_prefetch=0,
            grid=(N, n_tiles),
            in_specs=[
                pl.BlockSpec((pl.Squeezed(), Ci, tm), lambda n, s: (n, 0, s)),  # x tile
                pl.BlockSpec((KC, Ci), lambda n, s: (0, 0)),      # weight (resident)
                pl.BlockSpec((KC, 1), lambda n, s: (0, 0)),       # bias   (resident)
                pl.BlockSpec((KC, 1), lambda n, s: (0, 0)),       # alpha  (resident)
            ],
            out_specs=pl.BlockSpec((pl.Squeezed(), KC, tm), lambda n, s: (n, 0, s)),
        ),
        compiler_params=pltpu.CompilerParams(
            dimension_semantics=("parallel", "parallel"),
            vmem_limit_bytes=vmem_limit,
        ),
        cost_estimate=cost,
    )(x3, wfT, b_col, a_col)

    # ---- scatter 2x2x2 blocks back to NCDHW (layout parity with PyTorch) ----
    # Reads the bf16 intermediate once and writes the final out_dtype tensor once;
    # the dtype cast is fused into this same pass by XLA.
    y = y3.reshape(N, 2, 2, 2, Co, D, H, W)          # (n, kd, kh, kw, co, d, h, w)
    y = jnp.transpose(y, (0, 4, 5, 1, 6, 2, 7, 3))   # (n, co, d, kd, h, kh, w, kw)
    return y.reshape(N, Co, 2 * D, 2 * H, 2 * W).astype(out_dtype)


def upconv_block_ref(x, weight, bias, alpha):
    """Pure-JAX reference (f32 math) for correctness check."""
    N, Ci, D, H, W = x.shape
    Co = weight.shape[1]
    y = jnp.einsum("ncdhw,coijk->nodihjwk", x, weight)   # (n, co, d, kd, h, kh, w, kw)
    y = y + bias[None, :, None, None, None, None, None, None]
    y = jnp.where(y > 0.0, y,
                  alpha[None, :, None, None, None, None, None, None] * y)
    return y.reshape(N, Co, 2 * D, 2 * H, 2 * W)


if __name__ == "__main__":
    key = jax.random.PRNGKey(0)
    N, Ci, Co = 2, 4, 4
    D = H = W = 4

    k1, k2, k3 = jax.random.split(key, 3)
    x = jax.random.normal(k1, (N, Ci, D, H, W), dtype=jnp.float32)
    weight = 0.1 * jax.random.normal(k2, (Ci, Co, 2, 2, 2), dtype=jnp.float32)
    bias = 0.05 * jax.random.normal(k3, (Co,), dtype=jnp.float32)
    alpha = jnp.full((Co,), 0.25, dtype=jnp.float32)      # PReLU default init

    out = upconv_block(x, weight, bias, alpha)
    out = jax.block_until_ready(out)

    # Reference with the same bf16 operand rounding as the kernel; the kernel
    # additionally rounds its pre-scatter intermediate to bf16, so compare with a
    # bf16-level tolerance.
    x_c = x.astype(jnp.bfloat16).astype(jnp.float32)
    w_c = weight.astype(jnp.bfloat16).astype(jnp.float32)
    ref = upconv_block_ref(x_c, w_c, bias, alpha)

    assert out.shape == (N, Co, 2 * D, 2 * H, 2 * W)
    assert out.dtype == jnp.float32
    assert jnp.allclose(out, ref, atol=1e-2, rtol=1e-2), "mismatch vs reference"
    print("KERNEL_OK")
</pallas_src>

<mosaic_0001>
module attributes {stable_mosaic.version = 11 : i64} {
  func.func @upconv_prelu_kernel(%arg0: i32, %arg1: i32, %arg2: memref<1x4x64xf32, #tpu.memory_space<vmem>>, %arg3: memref<32x4xbf16, #tpu.memory_space<vmem>>, %arg4: memref<32x1xf32, #tpu.memory_space<vmem>>, %arg5: memref<32x1xf32, #tpu.memory_space<vmem>>, %arg6: memref<1x32x64xbf16, #tpu.memory_space<vmem>>) attributes {dimension_semantics = [#tpu.dimension_semantics<parallel>, #tpu.dimension_semantics<parallel>], iteration_bounds = array<i64: 2, 1>, scalar_prefetch = 0 : i64, scratch_operands = 0 : i64, tpu.core_type = #tpu.core_type<tc>, window_params = [{transform_indices = @transform_0, window_bounds = array<i64: 1, 4, 64>}, {pipeline_mode = #tpu.pipeline_mode<synchronous>, transform_indices = @transform_1, window_bounds = array<i64: 32, 4>}, {pipeline_mode = #tpu.pipeline_mode<synchronous>, transform_indices = @transform_2, window_bounds = array<i64: 32, 1>}, {pipeline_mode = #tpu.pipeline_mode<synchronous>, transform_indices = @transform_3, window_bounds = array<i64: 32, 1>}, {transform_indices = @transform_4, window_bounds = array<i64: 1, 32, 64>}]} {
    %c0 = arith.constant 0 : index
    %c0_0 = arith.constant 0 : index
    %c0_1 = arith.constant 0 : index
    %0 = vector.load %arg2[%c0, %c0_0, %c0_1] : memref<1x4x64xf32, #tpu.memory_space<vmem>>, vector<1x4x64xf32>
    %1 = vector.shape_cast %0 : vector<1x4x64xf32> to vector<4x64xf32>
    %2 = arith.truncf %1 : vector<4x64xf32> to vector<4x64xbf16>
    %c0_2 = arith.constant 0 : index
    %c0_3 = arith.constant 0 : index
    %3 = vector.load %arg3[%c0_2, %c0_3] : memref<32x4xbf16, #tpu.memory_space<vmem>>, vector<32x4xbf16>
    %cst = arith.constant dense<0.000000e+00> : vector<32x64xf32>
    %4 = tpu.matmul %3, %2, %cst {dimension_numbers = #tpu.dot_dimension_numbers<[1], [0], [0], [1], [0, 0, 1, 1], [], []>} : vector<32x4xbf16>, vector<4x64xbf16>, vector<32x64xf32> -> vector<32x64xf32>
    %c0_4 = arith.constant 0 : index
    %c0_5 = arith.constant 0 : index
    %5 = vector.load %arg4[%c0_4, %c0_5] : memref<32x1xf32, #tpu.memory_space<vmem>>, vector<32x1xf32>
    %6 = vector.broadcast %5 : vector<32x1xf32> to vector<32x64xf32>
    %7 = arith.addf %4, %6 : vector<32x64xf32>
    %cst_6 = arith.constant 0.000000e+00 : f32
    %8 = vector.broadcast %cst_6 : f32 to vector<32x64xf32>
    %9 = arith.cmpf ogt, %7, %8 : vector<32x64xf32>
    %c0_7 = arith.constant 0 : index
    %c0_8 = arith.constant 0 : index
    %10 = vector.load %arg5[%c0_7, %c0_8] : memref<32x1xf32, #tpu.memory_space<vmem>>, vector<32x1xf32>
    %11 = vector.broadcast %10 : vector<32x1xf32> to vector<32x64xf32>
    %12 = arith.mulf %11, %7 : vector<32x64xf32>
    %13 = arith.select %9, %7, %12 : vector<32x64xi1>, vector<32x64xf32>
    %14 = arith.truncf %13 : vector<32x64xf32> to vector<32x64xbf16>
    %c0_9 = arith.constant 0 : index
    %c0_10 = arith.constant 0 : index
    %c0_11 = arith.constant 0 : index
    %15 = vector.load %arg6[%c0_9, %c0_10, %c0_11] : memref<1x32x64xbf16, #tpu.memory_space<vmem>>, vector<1x32x64xbf16>
    %16 = vector.shape_cast %15 : vector<1x32x64xbf16> to vector<32x64xbf16>
    %17 = vector.shape_cast %14 : vector<32x64xbf16> to vector<1x32x64xbf16>
    tpu.vector_store %arg6[%c0_9, %c0_10, %c0_11], %17 {strides = array<i32>} : memref<1x32x64xbf16, #tpu.memory_space<vmem>>, vector<1x32x64xbf16>,
    return
  }
  func.func @transform_0(%arg0: i32, %arg1: i32) -> (i32, i32, i32) {
    %c0_i32 = arith.constant 0 : i32
    %c0_i32_0 = arith.constant 0 : i32
    return %arg0, %c0_i32, %arg1 : i32, i32, i32
  }
  func.func @transform_1(%arg0: i32, %arg1: i32) -> (i32, i32) {
    %c0_i32 = arith.constant 0 : i32
    %c0_i32_0 = arith.constant 0 : i32
    %c0_i32_1 = arith.constant 0 : i32
    return %c0_i32, %c0_i32_0 : i32, i32
  }
  func.func @transform_2(%arg0: i32, %arg1: i32) -> (i32, i32) {
    %c0_i32 = arith.constant 0 : i32
    %c0_i32_0 = arith.constant 0 : i32
    %c0_i32_1 = arith.constant 0 : i32
    return %c0_i32, %c0_i32_0 : i32, i32
  }
  func.func @transform_3(%arg0: i32, %arg1: i32) -> (i32, i32) {
    %c0_i32 = arith.constant 0 : i32
    %c0_i32_0 = arith.constant 0 : i32
    %c0_i32_1 = arith.constant 0 : i32
    return %c0_i32, %c0_i32_0 : i32, i32
  }
  func.func @transform_4(%arg0: i32, %arg1: i32) -> (i32, i32, i32) {
    %c0_i32 = arith.constant 0 : i32
    %c0_i32_0 = arith.constant 0 : i32
    return %arg0, %c0_i32, %arg1 : i32, i32, i32
  }
}

</mosaic_0001>

<bundles_post_ra>
// kernel: tpu_custom_call.1
= control target key start
LH: loop header
LB: loop body
LE: loop exit
PB: predicated region body
PF: predicated region fallthrough
CT: control target
= control target key end

     0   :  { %9 = vsyncpa [#allocation3], 0  ;;  %s756_s0 = inlined_call_operand.vmem [shape: f32[2,4,64], index: 0, kind: input, shape index: {}]   ;;  %s757_s1 = inlined_call_operand.vmem [shape: bf16[32,4], index: 1, kind: input, shape index: {}]   ;;  %s758_s2 = inlined_call_operand.vmem [shape: f32[32,1], index: 2, kind: input, shape index: {}]   ;;  %s759_s3 = inlined_call_operand.vmem [shape: f32[32,1], index: 3, kind: input, shape index: {}]   ;;  %s760_s4 = inlined_call_operand.hbm [shape: bf16[2,32,64], index: 4, kind: output, shape index: {}]  }
   0x1   :  { %11 = vsyncpa [#allocation3 + $0x1], 0  ;;  %s621_s15 = smov 0   ;;  %s623_s16 = smov 0  }
   0x2   :  { %s625_s17 = smov 0   ;;  %s627_s18 = smov 0  }
   0x3   :  { %s629_s19 = smov 0   ;;  %s631_s20 = smov 0  }
   0x4 LB: > { %s426_s21 = sadd.s32 4294967295, %s591_s20   ;;  %s427_s22 = sadd.s32 4294967294, %s591_s20   ;;  %s591_s20 = sphi %s631_s20, %s17_s20   ;;  %s587_s19 = sphi %s629_s19, %s767_s19   ;;  %s583_s18 = sphi %s627_s18, %s766_s18   ;;  %s579_s17 = sphi %s625_s17, %s765_s17   ;;  %s575_s16 = sphi %s623_s16, %s764_s16   ;;  %s571_s15 = sphi %s621_s15, %s763_s15  }
   0x5   : > { %s29_s23 = sadd.s32 1, %s587_s19  ;;  %s129_s24 = sadd.s32 1, %s579_s17 }
   0x6   : > { %p31_p0 = scmp.ge.s32.totalorder %s29_s23, 2  ;;  %p139_p1 = scmp.ne.s32.totalorder %s579_s17, %s575_s16 }
   0x7   : > { %p140_p2 = scmp.eq.s32.totalorder %s426_s21, 1  ;;  %p145_p3 = scmp.ne.s32.totalorder %s575_s16, %s571_s15 }
   0x8   : > { %s769_s23 = smov (%p31_p0, %s29_s23), 0  ;;  %p146_p5 = scmp.eq.s32.totalorder %s427_s22, 1 }
   0x9   : > { %p661_p4 = por %p140_p2, %p139_p1  ;;  %s124_s26 = ssub.s32 %s587_s19, %s769_s23 }
   0xa   : > { %p430_p6 = scmp.ge.s32.totalorder %s591_s20, 1  ;;  %p127_p7 = scmp.eq.s32.totalorder %s124_s26, 0 }
   0xb   : > { %p668_p8 = por %p146_p5, %p145_p3  ;;  %p183_p9 = scmp.lt.s32.totalorder %s591_s20, 3 }
   0xc   : > { %s674_s28 = scalar_select %p127_p7, %s579_s17, %s129_s24  }
   0xd   : > { %p184_p10 = pnand %p430_p6, %p183_p9 }
   0xe   : > { %p211_p11 = scmp.lt.s32.totalorder (!%p184_p10), %s583_s18, 1  ;;  %s208_s12 = sand.u32 (!%p184_p10), 1, %s575_s16  }
   0xf   : > { %187 = sbr.rel (%p184_p10) target bundleno = 177 (0xb1), region = 36  ;;  %s450_s14 = sshll.u32 (!%p184_p10), %s583_s18, 4 }
  0x10   : > { %s347_s26 = scalar_lea.hbm (!%p184_p10), %s760_s4, %s450_s14  ;;  %s335_s30 = scalar_lea.sflag (!%p184_p10), [#allocation3], %s208_s12 }
  0x11   : > { %s350_s29 = sshll.u32 (!%p184_p10), %s347_s26, 4  ;;  %s533_s9 = scalar_lea.hbm (!%p184_p10), %s760_s4, 32  ;;  %s351_s29 = int_to_ptr.hbm [resolvable:$true] %s350_s29 }
  0x12   : > { %s527_s5 = sshra.s32 (!%p184_p10), %s351_s29, 4  ;;  %s528_s5 = int_to_ptr.hbm [resolvable:$true] %s527_s5 }
  0x13   : > { %s529_s6 = scalar_lea.hbm (!%p184_p10), %s528_s5, 16  ;;  %p534_p1 = scmp.lt.s32.totalorder (!%p184_p10), %s528_s5, %s760_s4 }
  0x14   : > { %v227_v0 = vld [vmem:[%s758_s2 + $0x10] sm:$0xff]  ;;  %v225_v1 = vld [vmem:[%s758_s2] sm:$0xff]  ;;  %v593_v2 = vmov 0   ;;  %s212_s7 = scalar_select %p211_p11, %s583_s18, 1  ;;  %vm266_vm0 = vcmask 1041408   ;;  %v228_v5 = vld [vmem:[%s758_s2 + $0x18] sm:$0xff] }
  0x15   : > { %511 = vset.pattern.permute.xlu1 %v593_v2  ;;  %510 = vset.pattern.permute.xlu0 %v593_v2  ;;  %v293_v3 = vld [vmem:[%s759_s3] sm:$0xff]  ;;  %v226_v6 = vld [vmem:[%s758_s2 + $0x8] sm:$0xff]  ;;  %vm259_vm1 = vcmask 31744   ;;  %v296_v12 = vld [vmem:[%s759_s3 + $0x18] sm:$0xff]  ;;  %vm329_vm4 = vcmask 519168   ;;  %p530_p12 = scmp.ne.s32.totalorder %s528_s5, %s529_s6  ;;  %p535_p2 = scmp.lt.s32.totalorder %s533_s9, %s529_s6 }
  0x16   : > { %241 = vperm.xlu1 %511, %v227_v0   ;;  %231 = vperm.xlu0 %510, %v225_v1   ;;  %s432_s10 = sshll.u32 %s212_s7, 2  ;;  %v294_v9 = vld [vmem:[%s759_s3 + $0x8] sm:$0xff]  ;;  %v448_v10 = vld [vmem:[%s757_s1] sm:$0xff]  ;;  %v295_v13 = vld [vmem:[%s759_s3 + $0x10] sm:$0xff] }
  0x17   : > { %512 = vset.pattern.permute.xlu2 %v593_v2  ;;  %s217_s13 = scalar_lea.vmem %s756_s0, %s432_s10  ;;  %v449_v11 = vld [vmem:[%s757_s1 + $0x8] sm:$0xff]  ;;  %p531_p13 = pnand %p530_p12, %p661_p4 }
  0x18   : > { %299 = vperm.xlu2 %512, %v293_v3   ;;  %v219_v4 = vld [vmem:[%s217_s13] sm:$0xf]  ;;  %s431_s13 = sshll.u32 %s208_s12, 4  ;;  %p536_p3 = por %p535_p2, %p534_p1 }
  0x19   : > { %v220_v7 = vpack.c.bf16 %v219_v4, %v219_v4  ;;  %s210_s21 = scalar_lea.vmem [#allocation2], %s431_s13  ;;  %p532_p0 = pneg %p531_p13 }
  0x1a   : > { %s348_s18 = sshll.u32 %s210_s21, 4  ;;  %s349_s18 = int_to_ptr.vmem [resolvable:$true] %s348_s18 }
  0x1b   : > { %v268_v8 = vsel %vm266_vm0, %v220_v7, 0  ;;  %p537_p5 = pnand %p536_p3, %p532_p0 }
  0x1c   : > { %277 = vmatpush.bf16.msra.mxu0 %v268_v8  ;;  %451 = vmatpush.bf16.msra.mxu1 %v268_v8 }
  0x1e   : > { %246 = vperm.xlu1 %511, %v228_v5   ;;  %236 = vperm.xlu0 %510, %v226_v6  }
  0x1f   : > { %441 = vmatmul.msk.bf16.vlgmr.msra.gmra.mxu0 %vm259_vm1, %v448_v10  ;;  %442 = vmatmul.msk.bf16.vlgmr.msra.gmra.mxu1 %vm259_vm1, %v449_v11 }
  0x20   : > { %304 = vperm.xlu2 %512, %v294_v9  }
  0x26   : > { %314 = vperm.xlu1 %511, %v296_v12   ;;  %309 = vperm.xlu0 %510, %v295_v13  }
  0x72   : > { %v300_v18 = vpop.permute.xlu2 %299 }
  0x7a   : > { %v305_v35 = vpop.permute.xlu2 %304 }
  0x88   : > { %v232_v14 = vpop.permute.xlu0 %231  ;;  %v242_v15 = vpop.permute.xlu1 %241 }
  0x90   : > { %v237_v16 = vpop.permute.xlu0 %236  ;;  %v247_v17 = vpop.permute.xlu1 %246 }
  0x98   : > { %v310_v23 = vpop.permute.xlu0 %309  ;;  %v315_v34 = vpop.permute.xlu1 %314 }
  0x9c   : > { %v279_v19 = vpop.f32.mrf.mxu0  ;;  %v284_v20 = vpop.f32.mrf.mxu1 }
  0x9d   : > { %v280_v21 = vadd.f32 %v279_v19, %v232_v14  ;;  %v285_v22 = vadd.f32 %v284_v20, %v242_v15 }
  0x9f   : > { %vm289_vm2 = vcmp.gt.f32.partialorder %v280_v21, 0.0  ;;  %v317_v24 = vmul.f32 %v300_v18, %v280_v21  ;;  %vm291_vm3 = vcmp.gt.f32.partialorder %v285_v22, 0.0  ;;  %v319_v25 = vmul.f32 %v310_v23, %v285_v22 }
  0xa1   : > { %v321_v26 = vsel %vm289_vm2, %v280_v21, %v317_v24  ;;  %v323_v27 = vsel %vm291_vm3, %v285_v22, %v319_v25 }
  0xa2   : > { %v325_v28 = vpack.c.bf16 %v321_v26, %v321_v26  ;;  %v327_v29 = vpack.c.bf16 %v323_v27, %v323_v27 }
  0xa4   : > { %330 = vst.msk [vmem:[%s210_s21] sm:$0xf] %vm329_vm4, %v325_v28  ;;  %v281_v30 = vpop.f32.mrf.mxu0  ;;  %v286_v31 = vpop.f32.mrf.mxu1 }
  0xa5   : > { %332 = vst.msk [vmem:[%s210_s21 + $0x8] sm:$0xf] %vm329_vm4, %v327_v29  ;;  %v282_v32 = vadd.f32 %v281_v30, %v237_v16  ;;  %v287_v33 = vadd.f32 %v286_v31, %v247_v17 }
  0xa7   : > { %vm290_vm5 = vcmp.gt.f32.partialorder %v282_v32, 0.0  ;;  %v318_v36 = vmul.f32 %v305_v35, %v282_v32  ;;  %vm292_vm6 = vcmp.gt.f32.partialorder %v287_v33, 0.0  ;;  %v320_v37 = vmul.f32 %v315_v34, %v287_v33 }
  0xa9   : > { %v322_v38 = vsel %vm290_vm5, %v282_v32, %v318_v36  ;;  %v324_v39 = vsel %vm292_vm6, %v287_v33, %v320_v37 }
  0xaa   : > { %v326_v40 = vpack.c.bf16 %v322_v38, %v322_v38  ;;  %v328_v41 = vpack.c.bf16 %v324_v39, %v324_v39 }
  0xac   : > { %331 = vst.msk [vmem:[%s210_s21 + $0x4] sm:$0xf] %vm329_vm4, %v326_v40 }
  0xad   : > { %333 = vst.msk [vmem:[%s210_s21 + $0xc] sm:$0xf] %vm329_vm4, %v328_v41 }
  0xae   : > { %540 = shalt.err (!%p537_p5)
}
  0xaf   : > { %s594_s12 = smov 64   ;;  %s595_s13 = smov 4  }
  0xb0   : > { %452 = dma.vmem_to_hbm [thread:$0]  (%p661_p4), %s349_s18, 256, %s351_s29, %s335_s30, %s594_s12, %s594_s12, %s595_s13  }
  0xb1 PF: > { %p458_p6 = scmp.ge.s32.totalorder %s591_s20, 2  ;;  %s365_s14 = sand.u32 1, %s571_s15  }
  0xb2   : > { %s366_s21 = scalar_lea.sflag [#allocation3], %s365_s14 }
  0xb3   : > { %p455_p7 = pnand %p458_p6, %p668_p8 }
  0xb5   : > { %p456_p9 = pneg %p455_p7 }
  0xb7   : > { %566 = dma.done.wait (%p456_p9), %s366_s21, 256  }
  0xb8   : > { %568 = vsyncadd (%p456_p9), %s366_s21, 4294967040  ;;  %s17_s20 = sadd.s32 1, %s591_s20   ;;  %s763_s15 = smov %s575_s16 }
  0xb9   : > { %p14_p10 = scmp.ge.s32.totalorder %s17_s20, 4   ;;  %s764_s16 = smov %s579_s17 }
  0xba   : > { %s765_s17 = smov %s674_s28  ;;  %s766_s18 = smov %s587_s19 }
  0xbb   : > { %s767_s19 = smov %s769_s23  ;;  %16 = sbr.rel (!%p14_p10) target bundleno = 4 (0x4), region = 71 }
  0xc0   :  { %372 = vsyncpa [#allocation3], 1 }
  0xc1   :  { %374 = vsyncpa [#allocation3 + $0x1], 1 }

</bundles_post_ra>
